<compile_context>
chip_gen: v5e
topology: v5e:2x2
jax: 0.10.0
libtpu: 0.0.40
codegen_flags: <defaults>
</compile_context>

<pallas_src>
import jax
import jax.numpy as jnp
from jax.experimental import pallas as pl
from jax.experimental.pallas import tpu as pltpu

HIDDEN = 128  # hidden width of the DQN MLP (nn.Linear(state_size, 128), ...)


def _round_up(n, m):
    return ((n + m - 1) // m) * m


def dqn_kernel(x_ref, w1_ref, b1_ref, w2_ref, b2_ref, w3_ref, b3_ref, out_ref):
    # fc1 + relu (bf16 MXU operands, f32 accumulation)
    h1 = jnp.dot(x_ref[...], w1_ref[...], preferred_element_type=jnp.float32)
    h1 = jnp.maximum(h1 + b1_ref[...], 0.0).astype(jnp.bfloat16)
    # fc2 + relu
    h2 = jnp.dot(h1, w2_ref[...], preferred_element_type=jnp.float32)
    h2 = jnp.maximum(h2 + b2_ref[...], 0.0).astype(jnp.bfloat16)
    # fc3 (no activation): f32 store, unpadded action dim
    out_ref[...] = (
        jnp.dot(h2, w3_ref[...], preferred_element_type=jnp.float32) + b3_ref[...]
    )


def _choose_tb(B):
    """Pick a batch tile size.

    - bf16 packs 16 rows per vreg -> tiles are multiples of 16.
    - tiny batches: one tile (splitting only adds ~0.35us/step overhead).
    - mid batches: two tiles so v7x's two TensorCores both get a grid step.
    - large batches: big tiles (amortize step overhead) chosen to minimize
      zero-row padding waste.
    """
    B16 = _round_up(B, 16)
    if B16 < 256:
        return B16
    if B16 <= 2048:
        return _round_up(pl.cdiv(B16, 2), 16)
    best_tb, best_pad = 1024, None
    for cand in (1024, 512, 256):
        pad = _round_up(B16, cand) - B16
        if best_pad is None or pad < best_pad:
            best_tb, best_pad = cand, pad
    return best_tb


def prepare_params(params):
    """One-time weight prep (hoist out of the per-call path): bf16 weights,
    f32 biases shaped (1, out_features)."""
    return {
        "w1": params["w1"].astype(jnp.bfloat16),
        "b1": params["b1"].reshape(1, -1).astype(jnp.float32),
        "w2": params["w2"].astype(jnp.bfloat16),
        "b2": params["b2"].reshape(1, -1).astype(jnp.float32),
        "w3": params["w3"].astype(jnp.bfloat16),
        "b3": params["b3"].reshape(1, -1).astype(jnp.float32),
    }


def dqn_forward(x, params, *, tb=None):
    """x: (B, state_size) f32. params: output of prepare_params (bf16 weights).

    Intended to be called under jax.jit so the x cast/pad and output slice
    fuse with the pallas_call.
    """
    # Defensive casts: no-ops when prepare_params() was used.
    w1 = params["w1"].astype(jnp.bfloat16)
    w2 = params["w2"].astype(jnp.bfloat16)
    w3 = params["w3"].astype(jnp.bfloat16)
    b1 = params["b1"].reshape(1, -1).astype(jnp.float32)
    b2 = params["b2"].reshape(1, -1).astype(jnp.float32)
    b3 = params["b3"].reshape(1, -1).astype(jnp.float32)

    B, S = x.shape
    H = w1.shape[1]
    A = w3.shape[1]

    if tb is None:
        tb = _choose_tb(B)
    B_pad = _round_up(B, tb)

    x_bf = x.astype(jnp.bfloat16)
    if B_pad != B:
        x_bf = jnp.zeros((B_pad, S), jnp.bfloat16).at[:B].set(x_bf)

    grid = (B_pad // tb,)
    resident = lambda i: (0, 0)  # weights/biases: same block every grid step

    cost = pl.CostEstimate(
        flops=2 * B_pad * (S * H + H * H + H * A),
        transcendentals=0,
        bytes_accessed=(
            B_pad * S * 2            # x (bf16)
            + S * H * 2 + H * H * 2 + H * A * 2   # weights (bf16)
            + H * 4 + H * 4 + A * 4               # biases (f32)
            + B_pad * A * 4                       # output (f32)
        ),
    )

    out = pl.pallas_call(
        dqn_kernel,
        out_shape=jax.ShapeDtypeStruct((B_pad, A), jnp.float32),
        grid=grid,
        in_specs=[
            pl.BlockSpec((tb, S), lambda i: (i, 0)),   # x streams per batch tile
            pl.BlockSpec((S, H), resident),            # w1 (VMEM-resident)
            pl.BlockSpec((1, H), resident),            # b1
            pl.BlockSpec((H, H), resident),            # w2
            pl.BlockSpec((1, H), resident),            # b2
            pl.BlockSpec((H, A), resident),            # w3
            pl.BlockSpec((1, A), resident),            # b3
        ],
        out_specs=pl.BlockSpec((tb, A), lambda i: (i, 0)),
        compiler_params=pltpu.CompilerParams(
            dimension_semantics=("parallel",),
        ),
        cost_estimate=cost,
    )(x_bf, w1, b1, w2, b2, w3, b3)

    if B_pad != B:
        out = out[:B]
    return out


def init_params(key, state_size, action_size, hidden=HIDDEN):
    """Deterministic synthetic init mimicking PyTorch Linear's U(-1/sqrt(fan_in), ...)."""
    ks = jax.random.split(key, 6)

    def lin(kw, kb, fan_in, fan_out):
        bound = 1.0 / jnp.sqrt(float(fan_in))
        w = jax.random.uniform(kw, (fan_in, fan_out), jnp.float32, -bound, bound)
        b = jax.random.uniform(kb, (1, fan_out), jnp.float32, -bound, bound)
        return w, b

    w1, b1 = lin(ks[0], ks[1], state_size, hidden)
    w2, b2 = lin(ks[2], ks[3], hidden, hidden)
    w3, b3 = lin(ks[4], ks[5], hidden, action_size)
    return {"w1": w1, "b1": b1, "w2": w2, "b2": b2, "w3": w3, "b3": b3}


def dqn_ref(x, p):
    h1 = jnp.maximum(x @ p["w1"] + p["b1"], 0.0)
    h2 = jnp.maximum(h1 @ p["w2"] + p["b2"], 0.0)
    return h2 @ p["w3"] + p["b3"]


# TODO(synk): Adam optimizer / MSELoss from the PyTorch module are training-side
# and not part of the forward pass; not implemented as Pallas kernels.

if __name__ == "__main__":
    key = jax.random.PRNGKey(0)
    k_x, k_p = jax.random.split(key)

    batch = 8
    state_size = 16
    action_size = 8

    x = jax.random.normal(k_x, (batch, state_size), dtype=jnp.float32)
    params = init_params(k_p, state_size, action_size)
    prepared = prepare_params(params)  # one-time bf16 cast, hoisted out of the call path

    fwd = jax.jit(dqn_forward)

    # Small-batch path (single tile).
    out = jax.block_until_ready(fwd(x, prepared))
    ref = dqn_ref(x, params)
    assert out.shape == (batch, action_size)
    # bf16 matmul operands (f32 accumulate) vs a pure-f32 reference.
    assert jnp.allclose(out, ref, atol=5e-2, rtol=5e-2), "small-batch mismatch"

    # Multi-tile path (exercises batch padding + 2-step grid for v7x dual-TC).
    big_b = 300
    x_big = jax.random.normal(jax.random.PRNGKey(1), (big_b, state_size), jnp.float32)
    out_big = jax.block_until_ready(fwd(x_big, prepared))
    ref_big = dqn_ref(x_big, params)
    assert out_big.shape == (big_b, action_size)
    assert jnp.allclose(out_big, ref_big, atol=5e-2, rtol=5e-2), "multi-tile mismatch"

    print("KERNEL_OK")
</pallas_src>

<mosaic_0001>
module attributes {stable_mosaic.version = 11 : i64} {
  func.func @dqn_kernel(%arg0: i32, %arg1: memref<16x16xbf16, #tpu.memory_space<vmem>>, %arg2: memref<16x128xbf16, #tpu.memory_space<vmem>>, %arg3: memref<1x128xf32, #tpu.memory_space<vmem>>, %arg4: memref<128x128xbf16, #tpu.memory_space<vmem>>, %arg5: memref<1x128xf32, #tpu.memory_space<vmem>>, %arg6: memref<128x8xbf16, #tpu.memory_space<vmem>>, %arg7: memref<1x8xf32, #tpu.memory_space<vmem>>, %arg8: memref<16x8xf32, #tpu.memory_space<vmem>>) attributes {dimension_semantics = [#tpu.dimension_semantics<parallel>], iteration_bounds = array<i64: 1>, scalar_prefetch = 0 : i64, scratch_operands = 0 : i64, tpu.core_type = #tpu.core_type<tc>, window_params = [{transform_indices = @transform_0, window_bounds = array<i64: 16, 16>}, {pipeline_mode = #tpu.pipeline_mode<synchronous>, transform_indices = @transform_1, window_bounds = array<i64: 16, 128>}, {pipeline_mode = #tpu.pipeline_mode<synchronous>, transform_indices = @transform_2, window_bounds = array<i64: 1, 128>}, {pipeline_mode = #tpu.pipeline_mode<synchronous>, transform_indices = @transform_3, window_bounds = array<i64: 128, 128>}, {pipeline_mode = #tpu.pipeline_mode<synchronous>, transform_indices = @transform_4, window_bounds = array<i64: 1, 128>}, {pipeline_mode = #tpu.pipeline_mode<synchronous>, transform_indices = @transform_5, window_bounds = array<i64: 128, 8>}, {pipeline_mode = #tpu.pipeline_mode<synchronous>, transform_indices = @transform_6, window_bounds = array<i64: 1, 8>}, {transform_indices = @transform_7, window_bounds = array<i64: 16, 8>}]} {
    %c0 = arith.constant 0 : index
    %c0_0 = arith.constant 0 : index
    %0 = vector.load %arg1[%c0, %c0_0] : memref<16x16xbf16, #tpu.memory_space<vmem>>, vector<16x16xbf16>
    %c0_1 = arith.constant 0 : index
    %c0_2 = arith.constant 0 : index
    %1 = vector.load %arg2[%c0_1, %c0_2] : memref<16x128xbf16, #tpu.memory_space<vmem>>, vector<16x128xbf16>
    %cst = arith.constant dense<0.000000e+00> : vector<16x128xf32>
    %2 = tpu.matmul %0, %1, %cst {dimension_numbers = #tpu.dot_dimension_numbers<[1], [0], [0], [1], [0, 0, 1, 1], [], []>} : vector<16x16xbf16>, vector<16x128xbf16>, vector<16x128xf32> -> vector<16x128xf32>
    %c0_3 = arith.constant 0 : index
    %c0_4 = arith.constant 0 : index
    %3 = vector.load %arg3[%c0_3, %c0_4] : memref<1x128xf32, #tpu.memory_space<vmem>>, vector<1x128xf32>
    %4 = vector.broadcast %3 : vector<1x128xf32> to vector<16x128xf32>
    %5 = arith.addf %2, %4 : vector<16x128xf32>
    %cst_5 = arith.constant 0.000000e+00 : f32
    %6 = vector.broadcast %cst_5 : f32 to vector<16x128xf32>
    %7 = arith.maximumf %5, %6 : vector<16x128xf32>
    %8 = arith.truncf %7 : vector<16x128xf32> to vector<16x128xbf16>
    %c0_6 = arith.constant 0 : index
    %c0_7 = arith.constant 0 : index
    %9 = vector.load %arg4[%c0_6, %c0_7] : memref<128x128xbf16, #tpu.memory_space<vmem>>, vector<128x128xbf16>
    %cst_8 = arith.constant dense<0.000000e+00> : vector<16x128xf32>
    %10 = tpu.matmul %8, %9, %cst_8 {dimension_numbers = #tpu.dot_dimension_numbers<[1], [0], [0], [1], [0, 0, 1, 1], [], []>} : vector<16x128xbf16>, vector<128x128xbf16>, vector<16x128xf32> -> vector<16x128xf32>
    %c0_9 = arith.constant 0 : index
    %c0_10 = arith.constant 0 : index
    %11 = vector.load %arg5[%c0_9, %c0_10] : memref<1x128xf32, #tpu.memory_space<vmem>>, vector<1x128xf32>
    %12 = vector.broadcast %11 : vector<1x128xf32> to vector<16x128xf32>
    %13 = arith.addf %10, %12 : vector<16x128xf32>
    %cst_11 = arith.constant 0.000000e+00 : f32
    %14 = vector.broadcast %cst_11 : f32 to vector<16x128xf32>
    %15 = arith.maximumf %13, %14 : vector<16x128xf32>
    %16 = arith.truncf %15 : vector<16x128xf32> to vector<16x128xbf16>
    %c0_12 = arith.constant 0 : index
    %c0_13 = arith.constant 0 : index
    %17 = vector.load %arg6[%c0_12, %c0_13] : memref<128x8xbf16, #tpu.memory_space<vmem>>, vector<128x8xbf16>
    %cst_14 = arith.constant dense<0.000000e+00> : vector<16x8xf32>
    %18 = tpu.matmul %16, %17, %cst_14 {dimension_numbers = #tpu.dot_dimension_numbers<[1], [0], [0], [1], [0, 0, 1, 1], [], []>} : vector<16x128xbf16>, vector<128x8xbf16>, vector<16x8xf32> -> vector<16x8xf32>
    %c0_15 = arith.constant 0 : index
    %c0_16 = arith.constant 0 : index
    %19 = vector.load %arg7[%c0_15, %c0_16] : memref<1x8xf32, #tpu.memory_space<vmem>>, vector<1x8xf32>
    %20 = vector.broadcast %19 : vector<1x8xf32> to vector<16x8xf32>
    %21 = arith.addf %18, %20 : vector<16x8xf32>
    %c0_17 = arith.constant 0 : index
    %c0_18 = arith.constant 0 : index
    %22 = vector.load %arg8[%c0_17, %c0_18] : memref<16x8xf32, #tpu.memory_space<vmem>>, vector<16x8xf32>
    tpu.vector_store %arg8[%c0_17, %c0_18], %21 {strides = array<i32>} : memref<16x8xf32, #tpu.memory_space<vmem>>, vector<16x8xf32>,
    return
  }
  func.func @transform_0(%arg0: i32) -> (i32, i32) {
    %c0_i32 = arith.constant 0 : i32
    %c0_i32_0 = arith.constant 0 : i32
    return %arg0, %c0_i32 : i32, i32
  }
  func.func @transform_1(%arg0: i32) -> (i32, i32) {
    %c0_i32 = arith.constant 0 : i32
    %c0_i32_0 = arith.constant 0 : i32
    %c0_i32_1 = arith.constant 0 : i32
    return %c0_i32, %c0_i32_0 : i32, i32
  }
  func.func @transform_2(%arg0: i32) -> (i32, i32) {
    %c0_i32 = arith.constant 0 : i32
    %c0_i32_0 = arith.constant 0 : i32
    %c0_i32_1 = arith.constant 0 : i32
    return %c0_i32, %c0_i32_0 : i32, i32
  }
  func.func @transform_3(%arg0: i32) -> (i32, i32) {
    %c0_i32 = arith.constant 0 : i32
    %c0_i32_0 = arith.constant 0 : i32
    %c0_i32_1 = arith.constant 0 : i32
    return %c0_i32, %c0_i32_0 : i32, i32
  }
  func.func @transform_4(%arg0: i32) -> (i32, i32) {
    %c0_i32 = arith.constant 0 : i32
    %c0_i32_0 = arith.constant 0 : i32
    %c0_i32_1 = arith.constant 0 : i32
    return %c0_i32, %c0_i32_0 : i32, i32
  }
  func.func @transform_5(%arg0: i32) -> (i32, i32) {
    %c0_i32 = arith.constant 0 : i32
    %c0_i32_0 = arith.constant 0 : i32
    %c0_i32_1 = arith.constant 0 : i32
    return %c0_i32, %c0_i32_0 : i32, i32
  }
  func.func @transform_6(%arg0: i32) -> (i32, i32) {
    %c0_i32 = arith.constant 0 : i32
    %c0_i32_0 = arith.constant 0 : i32
    %c0_i32_1 = arith.constant 0 : i32
    return %c0_i32, %c0_i32_0 : i32, i32
  }
  func.func @transform_7(%arg0: i32) -> (i32, i32) {
    %c0_i32 = arith.constant 0 : i32
    %c0_i32_0 = arith.constant 0 : i32
    return %arg0, %c0_i32 : i32, i32
  }
}

</mosaic_0001>

<bundles_post_ra>
// kernel: dqn_forward.1
= control target key start
LH: loop header
LB: loop body
LE: loop exit
PB: predicated region body
PF: predicated region fallthrough
CT: control target
= control target key end

     0   :  { %vm46_vm0 = vcmask 130048   ;;  %vm234_vm1 = vcmask 64512   ;;  %s444_s1 = inlined_call_operand.vmem [shape: bf16[16,128], index: 1, kind: input, shape index: {}]   ;;  %s445_s0 = inlined_call_operand.vmem [shape: bf16[16,16], index: 0, kind: input, shape index: {}]   ;;  %s446_s3 = inlined_call_operand.vmem [shape: bf16[128,128], index: 3, kind: input, shape index: {}]   ;;  %s447_s2 = inlined_call_operand.vmem [shape: f32[1,128], index: 2, kind: input, shape index: {}]   ;;  %s448_s4 = inlined_call_operand.vmem [shape: f32[1,128], index: 4, kind: input, shape index: {}]   ;;  %s449_s5 = inlined_call_operand.vmem [shape: bf16[128,8], index: 5, kind: input, shape index: {}]   ;;  %s450_s6 = inlined_call_operand.vmem [shape: f32[1,8], index: 6, kind: input, shape index: {}]   ;;  %s451_s7 = inlined_call_operand.vmem [shape: f32[16,8], index: 7, kind: output, shape index: {}]  }
   0x1   :  { %v315_v0 = vld [vmem:[%s444_s1] sm:$0xff]  ;;  %v323_v1 = vld [vmem:[%s446_s3 + $0x38] sm:$0xff]  ;;  %v322_v3 = vld [vmem:[%s446_s3 + $0x30] sm:$0xff] }
   0x2   :  { %v314_v2 = vld [vmem:[%s445_s0] sm:$0xff]  ;;  %57 = vmatpush.bf16.msra.mxu0 %v315_v0  ;;  %135 = vmatpush.bf16.msra.mxu1 %v323_v1  ;;  %v321_v4 = vld [vmem:[%s446_s3 + $0x28] sm:$0xff]  ;;  %v319_v6 = vld [vmem:[%s446_s3 + $0x18] sm:$0xff] }
   0x3   :  { %v320_v5 = vld [vmem:[%s446_s3 + $0x20] sm:$0xff]  ;;  %v318_v7 = vld [vmem:[%s446_s3 + $0x10] sm:$0xff]  ;;  %v317_v8 = vld [vmem:[%s446_s3 + $0x8] sm:$0xff] }
   0x4   :  { %v316_v9 = vld [vmem:[%s446_s3] sm:$0xff]  ;;  %v331_v10 = vld [vmem:[%s449_s5 + $0x38] sm:$0xff]  ;;  %v330_v11 = vld [vmem:[%s449_s5 + $0x30] sm:$0xff] }
   0x5   :  { %249 = vmatmul.msk.bf16.vlgmr.msra.gmra.mxu0 %vm46_vm0, %v314_v2  ;;  %220 = vmatpush.bf16.msra.mxu2 %v331_v10  ;;  %v329_v12 = vld [vmem:[%s449_s5 + $0x28] sm:$0xff]  ;;  %v328_v13 = vld [vmem:[%s449_s5 + $0x20] sm:$0xff]  ;;  %v327_v22 = vld [vmem:[%s449_s5 + $0x18] sm:$0xff] }
   0x6   :  { %136 = vmatpush.bf16.msra.mxu1 %v322_v3  ;;  %v332_v15 = vld [vmem:[%s447_s2] ss:$0 sm:$0xff]  ;;  %v326_v23 = vld [vmem:[%s449_s5 + $0x10] sm:$0xff]  ;;  %v325_v24 = vld [vmem:[%s449_s5 + $0x8] sm:$0xff] }
   0x7   :  { %v324_v25 = vld [vmem:[%s449_s5] sm:$0xff] }
   0x8   :  { %v333_v27 = vld [vmem:[%s448_s4] ss:$0 sm:$0xff] }
   0x9   :  { %221 = vmatpush.bf16.msra.mxu2 %v330_v11  ;;  %v334_v34 = vld [vmem:[%s450_s6] ss:$0 sm:$0xff] }
   0xa   :  { %137 = vmatpush.bf16.msra.mxu1 %v321_v4 }
   0xd   :  { %222 = vmatpush.bf16.msra.mxu2 %v329_v12 }
   0xe   :  { %138 = vmatpush.bf16.msra.mxu1 %v320_v5 }
  0x11   :  { %223 = vmatpush.bf16.msra.mxu2 %v328_v13 }
  0x12   :  { %139 = vmatpush.bf16.msra.mxu1 %v319_v6 }
  0x15   :  { %224 = vmatpush.bf16.msra.mxu2 %v327_v22 }
  0x16   :  { %140 = vmatpush.bf16.msra.mxu1 %v318_v7 }
  0x19   :  { %225 = vmatpush.bf16.msra.mxu2 %v326_v23 }
  0x1a   :  { %141 = vmatpush.bf16.msra.mxu1 %v317_v8 }
  0x1d   :  { %226 = vmatpush.bf16.msra.mxu2 %v325_v24 }
  0x1e   :  { %142 = vmatpush.bf16.msra.mxu1 %v316_v9 }
  0x21   :  { %227 = vmatpush.bf16.msra.mxu2 %v324_v25 }
  0x82   :  { %v59_v14 = vpop.f32.mrf.mxu0 }
  0x83   :  { %v60_v16 = vadd.f32 %v332_v15, %v59_v14 }
  0x85   :  { %v64_v19 = vmax.f32 %v60_v16, 0.0 }
  0x8a   :  { %v61_v17 = vpop.f32.mrf.mxu0 }
  0x8b   :  { %v62_v18 = vadd.f32 %v332_v15, %v61_v17 }
  0x8d   :  { %v65_v20 = vmax.f32 %v62_v18, 0.0 }
  0x8f   :  { %v66_v21 = vpack.c.bf16 %v65_v20, %v64_v19 }
  0x91   :  { %143 = vmatmul.bf16.vlgmr.msra.gmra.mxu1 %v66_v21 }
 0x10e   :  { %v144_v26 = vpop.f32.mrf.mxu1 }
 0x10f   :  { %v145_v28 = vadd.f32 %v333_v27, %v144_v26 }
 0x111   :  { %v149_v31 = vmax.f32 %v145_v28, 0.0 }
 0x116   :  { %v146_v29 = vpop.f32.mrf.mxu1 }
 0x117   :  { %v147_v30 = vadd.f32 %v333_v27, %v146_v29 }
 0x119   :  { %v150_v32 = vmax.f32 %v147_v30, 0.0 }
 0x11b   :  { %v151_v33 = vpack.c.bf16 %v150_v32, %v149_v31 }
 0x11d   :  { %228 = vmatmul.bf16.vlgmr.msra.gmra.mxu2 %v151_v33 }
 0x1a0   :  { %v229_v35 = vpop.f32.mrf.mxu2 }
 0x1a1   :  { %v230_v36 = vadd.f32 %v334_v34, %v229_v35 }
 0x1a3   :  { %235 = vst.msk [vmem:[%s451_s7] sm:$0xff] %vm234_vm1, %v230_v36 }
 0x1a8   :  { %v231_v37 = vpop.f32.mrf.mxu2 }
 0x1a9   :  { %v232_v38 = vadd.f32 %v334_v34, %v231_v37 }
 0x1ab   :  { %236 = vst.msk [vmem:[%s451_s7 + $0x8] sm:$0xff] %vm234_vm1, %v232_v38 }

</bundles_post_ra>
